<compile_context>
chip_gen: v7x
topology: tpu7x:2x2x1
jax: 0.10.0
libtpu: 0.0.40
codegen_flags: <defaults>
</compile_context>

<pallas_src>
import math
import functools

import jax
import jax.numpy as jnp
from jax.experimental import pallas as pl
from jax.experimental.pallas import tpu as pltpu


_NEG_BIG = -1e30  # finite "-inf" so online-max updates never produce NaN


def _arc_margin_loss_kernel(cos_ref, label_ref, loss_ref,
                            m_ref, s_ref, cl_ref, *,
                            scale, cos_m, sin_m, th, mmm, easy_margin,
                            num_classes, batch, mask_cols, mask_rows):
    i = pl.program_id(0)                    # batch tile (parallel)
    j = pl.program_id(1)                    # class tile (reduction, innermost)
    last_j = pl.num_programs(1) - 1

    @pl.when(j == 0)
    def _init():
        m_ref[...] = jnp.full_like(m_ref, _NEG_BIG)
        s_ref[...] = jnp.zeros_like(s_ref)
        cl_ref[...] = jnp.zeros_like(cl_ref)

    cos = cos_ref[...].astype(jnp.float32)              # (block_b, block_c)
    labels = label_ref[...]                             # (block_b, 1) int32
    bb, bc = cos.shape

    col = jax.lax.broadcasted_iota(jnp.int32, (bb, bc), 1) + j * bc
    is_label = col == labels
    drop = is_label
    if mask_cols:
        drop = drop | (col >= num_classes)              # padded class columns

    # Hot path: scale, mask, online max / sumexp (target column excluded).
    logits = cos * scale
    masked = jnp.where(drop, _NEG_BIG, logits)

    m_old = m_ref[...]
    m_new = jnp.maximum(m_old, jnp.max(masked, axis=-1, keepdims=True))
    s_ref[...] = (s_ref[...] * jnp.exp(m_old - m_new)
                  + jnp.sum(jnp.exp(masked - m_new), axis=-1, keepdims=True))
    m_ref[...] = m_new

    # Gather the target-column cosine (at most one match per row per tile).
    cl_ref[...] += jnp.sum(jnp.where(is_label, cos, 0.0), axis=-1, keepdims=True)

    @pl.when(j == last_j)
    def _finalize():
        cl = cl_ref[...]                                  # (block_b, 1)
        sine = jnp.sqrt(jnp.maximum(1.0 - cl * cl, 0.0))  # clamp vs rounding
        phi = cl * cos_m - sine * sin_m
        if easy_margin:
            phi = jnp.where(cl > 0.0, phi, cl)
        else:
            phi = jnp.where(cl > th, phi, cl - mmm)
        tgt = phi * scale                                 # target logit

        m_run = m_ref[...]
        m_fin = jnp.maximum(m_run, tgt)
        lse = m_fin + jnp.log(s_ref[...] * jnp.exp(m_run - m_fin)
                              + jnp.exp(tgt - m_fin))
        loss_row = lse - tgt                              # per-row cross entropy

        if mask_rows:
            row = jax.lax.broadcasted_iota(jnp.int32, (bb, 1), 0) + i * bb
            loss_row = jnp.where(row < batch, loss_row, 0.0)
        loss_ref[...] = loss_row


def _round_up(x, m):
    return (x + m - 1) // m * m


def arc_margin_loss(cosine, label, *, scale=32.0, margin=0.2, easy_margin=False,
                    block_b=None, block_c=None, vmem_limit_bytes=None):
    """cosine: (B, C) float32/bfloat16, label: (B,) int -> scalar f32 loss."""
    B, C = cosine.shape
    assert C >= 2, "need at least 2 classes"

    cos_m = math.cos(margin)
    sin_m = math.sin(margin)
    th = math.cos(math.pi - margin)
    mmm = 1.0 + math.cos(math.pi - margin)

    # Tile sizing: lane-dense class tiles (multiple of 128), sublane-aligned
    # batch tiles (multiple of 8; 16 helps bf16 packing). Class tiles <= 2048
    # keep double-buffered inputs comfortably inside v7x's 64 MiB VMEM.
    if block_b is None:
        block_b = min(128, _round_up(B, 16))
    if block_c is None:
        block_c = min(2048, _round_up(C, 128))
    block_b = _round_up(block_b, 8)
    block_c = _round_up(block_c, 128)

    B_pad = _round_up(B, block_b)
    C_pad = _round_up(C, block_c)
    cos_p = jnp.pad(cosine, ((0, B_pad - B), (0, C_pad - C)))
    lbl_p = jnp.pad(label.astype(jnp.int32).reshape(B, 1),
                    ((0, B_pad - B), (0, 0)))

    grid = (B_pad // block_b, C_pad // block_c)

    if vmem_limit_bytes is None:
        tile_bytes = block_b * block_c * cos_p.dtype.itemsize
        # double-buffered input tiles + small scratch; below v7x's 64 MiB
        vmem_limit_bytes = int(min(48 * 2**20, max(32 * 2**20, 4 * tile_bytes)))

    kernel = functools.partial(
        _arc_margin_loss_kernel,
        scale=float(scale), cos_m=cos_m, sin_m=sin_m, th=th, mmm=mmm,
        easy_margin=easy_margin, num_classes=C, batch=B,
        mask_cols=(C_pad != C), mask_rows=(B_pad != B))

    per_row = pl.pallas_call(
        kernel,
        out_shape=jax.ShapeDtypeStruct((B_pad, 1), jnp.float32),
        grid_spec=pltpu.PrefetchScalarGridSpec(
            num_scalar_prefetch=0,
            grid=grid,
            in_specs=[
                pl.BlockSpec((block_b, block_c), lambda i, j: (i, j)),
                # label block pinned per batch tile -> not re-DMA'd per class step
                pl.BlockSpec((block_b, 1), lambda i, j: (i, 0)),
            ],
            out_specs=pl.BlockSpec((block_b, 1), lambda i, j: (i, 0)),
            scratch_shapes=[
                pltpu.VMEM((block_b, 1), jnp.float32),   # running max
                pltpu.VMEM((block_b, 1), jnp.float32),   # running sumexp
                pltpu.VMEM((block_b, 1), jnp.float32),   # target-column cosine
            ]),
        compiler_params=pltpu.CompilerParams(
            dimension_semantics=("parallel", "arbitrary"),
            vmem_limit_bytes=vmem_limit_bytes),
    )(cos_p, lbl_p)

    # Tiny (B,) mean outside the kernel (keeps the batch axis megacore-parallel).
    return jnp.sum(per_row) / B


def _reference_arc_margin_loss(cosine, label, *, scale=32.0, margin=0.2,
                               easy_margin=False):
    cos_m = math.cos(margin)
    sin_m = math.sin(margin)
    th = math.cos(math.pi - margin)
    mmm = 1.0 + math.cos(math.pi - margin)
    cosine = cosine.astype(jnp.float32)
    sine = jnp.sqrt(jnp.maximum(1.0 - cosine ** 2, 0.0))
    phi = cosine * cos_m - sine * sin_m
    if easy_margin:
        phi = jnp.where(cosine > 0, phi, cosine)
    else:
        phi = jnp.where(cosine > th, phi, cosine - mmm)
    one_hot = jax.nn.one_hot(label, cosine.shape[1], dtype=jnp.float32)
    logits = (one_hot * phi + (1.0 - one_hot) * cosine) * scale
    logp = jax.nn.log_softmax(logits, axis=-1)
    return -jnp.mean(jnp.take_along_axis(logp, label[:, None], axis=1))


if __name__ == "__main__":
    # Small, deliberately ragged shapes (B=10, C=300) so the multi-tile grid,
    # online logsumexp, and row/column masking paths are all exercised.
    B, C = 10, 300
    key = jax.random.PRNGKey(0)
    kc, kl = jax.random.split(key)
    cosine = jax.random.uniform(kc, (B, C), jnp.float32, minval=-1.0, maxval=1.0)
    cosine = cosine.astype(jnp.bfloat16)   # storage dtype; kernel math is f32
    label = jax.random.randint(kl, (B,), 0, C, dtype=jnp.int32)

    loss = arc_margin_loss(cosine, label, scale=32.0, margin=0.2,
                           easy_margin=False, block_b=8, block_c=128)
    loss = jax.block_until_ready(loss)

    ref = _reference_arc_margin_loss(cosine, label, scale=32.0, margin=0.2,
                                     easy_margin=False)
    assert jnp.allclose(loss, ref, rtol=1e-4, atol=1e-4), (loss, ref)
    print("KERNEL_OK")
</pallas_src>

<mosaic_0001>
module attributes {stable_mosaic.version = 11 : i64} {
  func.func @_arc_margin_loss_kernel(%arg0: i32, %arg1: i32, %arg2: memref<8x128xbf16, #tpu.memory_space<vmem>>, %arg3: memref<8x1xi32, #tpu.memory_space<vmem>>, %arg4: memref<8x1xf32, #tpu.memory_space<vmem>>, %arg5: memref<8x1xf32, #tpu.memory_space<vmem>>, %arg6: memref<8x1xf32, #tpu.memory_space<vmem>>, %arg7: memref<8x1xf32, #tpu.memory_space<vmem>>) attributes {dimension_semantics = [#tpu.dimension_semantics<parallel>, #tpu.dimension_semantics<arbitrary>], iteration_bounds = array<i64: 2, 3>, scalar_prefetch = 0 : i64, scratch_operands = 3 : i64, tpu.core_type = #tpu.core_type<tc>, window_params = [{transform_indices = @transform_0, window_bounds = array<i64: 8, 128>}, {transform_indices = @transform_1, window_bounds = array<i64: 8, 1>}, {transform_indices = @transform_2, window_bounds = array<i64: 8, 1>}]} {
    %c0_i32 = arith.constant 0 : i32
    %0 = arith.cmpi eq, %arg1, %c0_i32 : i32
    %1 = arith.extui %0 : i1 to i32
    %c0_i32_0 = arith.constant 0 : i32
    %2 = arith.cmpi ne, %1, %c0_i32_0 : i32
    scf.if %2 {
      %cst_22 = arith.constant -1.000000e+30 : f32
      %45 = vector.broadcast %cst_22 : f32 to vector<8x1xf32>
      %c0_23 = arith.constant 0 : index
      %c0_24 = arith.constant 0 : index
      %46 = vector.load %arg5[%c0_23, %c0_24] : memref<8x1xf32, #tpu.memory_space<vmem>>, vector<8x1xf32>
      tpu.vector_store %arg5[%c0_23, %c0_24], %45 {strides = array<i32>} : memref<8x1xf32, #tpu.memory_space<vmem>>, vector<8x1xf32>,
      %cst_25 = arith.constant 0.000000e+00 : f32
      %47 = vector.broadcast %cst_25 : f32 to vector<8x1xf32>
      %c0_26 = arith.constant 0 : index
      %c0_27 = arith.constant 0 : index
      %48 = vector.load %arg6[%c0_26, %c0_27] : memref<8x1xf32, #tpu.memory_space<vmem>>, vector<8x1xf32>
      tpu.vector_store %arg6[%c0_26, %c0_27], %47 {strides = array<i32>} : memref<8x1xf32, #tpu.memory_space<vmem>>, vector<8x1xf32>,
      %cst_28 = arith.constant 0.000000e+00 : f32
      %49 = vector.broadcast %cst_28 : f32 to vector<8x1xf32>
      %c0_29 = arith.constant 0 : index
      %c0_30 = arith.constant 0 : index
      %50 = vector.load %arg7[%c0_29, %c0_30] : memref<8x1xf32, #tpu.memory_space<vmem>>, vector<8x1xf32>
      tpu.vector_store %arg7[%c0_29, %c0_30], %49 {strides = array<i32>} : memref<8x1xf32, #tpu.memory_space<vmem>>, vector<8x1xf32>,
    } else {
    }
    %c0 = arith.constant 0 : index
    %c0_1 = arith.constant 0 : index
    %3 = vector.load %arg2[%c0, %c0_1] : memref<8x128xbf16, #tpu.memory_space<vmem>>, vector<8x128xbf16>
    %4 = arith.extf %3 : vector<8x128xbf16> to vector<8x128xf32>
    %c0_2 = arith.constant 0 : index
    %c0_3 = arith.constant 0 : index
    %5 = vector.load %arg3[%c0_2, %c0_3] : memref<8x1xi32, #tpu.memory_space<vmem>>, vector<8x1xi32>
    %6 = tpu.iota {dimensions = array<i32: 1>} : vector<8x128xi32>
    %c128_i32 = arith.constant 128 : i32
    %7 = arith.muli %arg1, %c128_i32 : i32
    %8 = vector.broadcast %7 : i32 to vector<8x128xi32>
    %9 = arith.addi %6, %8 : vector<8x128xi32>
    %10 = vector.broadcast %5 : vector<8x1xi32> to vector<8x128xi32>
    %11 = arith.cmpi eq, %9, %10 : vector<8x128xi32>
    %c300_i32 = arith.constant 300 : i32
    %12 = vector.broadcast %c300_i32 : i32 to vector<8x128xi32>
    %13 = arith.cmpi sge, %9, %12 : vector<8x128xi32>
    %14 = arith.ori %11, %13 : vector<8x128xi1>
    %cst = arith.constant 3.200000e+01 : f32
    %15 = vector.broadcast %cst : f32 to vector<8x128xf32>
    %16 = arith.mulf %4, %15 : vector<8x128xf32>
    %cst_4 = arith.constant -1.000000e+30 : f32
    %17 = vector.broadcast %cst_4 : f32 to vector<8x128xf32>
    %18 = arith.select %14, %17, %16 : vector<8x128xi1>, vector<8x128xf32>
    %c0_5 = arith.constant 0 : index
    %c0_6 = arith.constant 0 : index
    %19 = vector.load %arg5[%c0_5, %c0_6] : memref<8x1xf32, #tpu.memory_space<vmem>>, vector<8x1xf32>
    %cst_7 = arith.constant dense<0xFF800000> : vector<8xf32>
    %20 = vector.multi_reduction <maximumf>, %18, %cst_7 [1] : vector<8x128xf32> to vector<8xf32>
    %21 = vector.shape_cast %20 : vector<8xf32> to vector<8x1xf32>
    %22 = arith.maximumf %19, %21 : vector<8x1xf32>
    %c0_8 = arith.constant 0 : index
    %c0_9 = arith.constant 0 : index
    %23 = vector.load %arg6[%c0_8, %c0_9] : memref<8x1xf32, #tpu.memory_space<vmem>>, vector<8x1xf32>
    %24 = arith.subf %19, %22 : vector<8x1xf32>
    %25 = math.exp %24 : vector<8x1xf32>
    %26 = arith.mulf %23, %25 : vector<8x1xf32>
    %27 = vector.broadcast %22 : vector<8x1xf32> to vector<8x128xf32>
    %28 = arith.subf %18, %27 : vector<8x128xf32>
    %29 = math.exp %28 : vector<8x128xf32>
    %cst_10 = arith.constant dense<0.000000e+00> : vector<8xf32>
    %30 = vector.multi_reduction <add>, %29, %cst_10 [1] : vector<8x128xf32> to vector<8xf32>
    %31 = vector.shape_cast %30 : vector<8xf32> to vector<8x1xf32>
    %32 = arith.addf %26, %31 : vector<8x1xf32>
    %c0_11 = arith.constant 0 : index
    %c0_12 = arith.constant 0 : index
    %33 = vector.load %arg6[%c0_11, %c0_12] : memref<8x1xf32, #tpu.memory_space<vmem>>, vector<8x1xf32>
    tpu.vector_store %arg6[%c0_11, %c0_12], %32 {strides = array<i32>} : memref<8x1xf32, #tpu.memory_space<vmem>>, vector<8x1xf32>,
    %c0_13 = arith.constant 0 : index
    %c0_14 = arith.constant 0 : index
    %34 = vector.load %arg5[%c0_13, %c0_14] : memref<8x1xf32, #tpu.memory_space<vmem>>, vector<8x1xf32>
    tpu.vector_store %arg5[%c0_13, %c0_14], %22 {strides = array<i32>} : memref<8x1xf32, #tpu.memory_space<vmem>>, vector<8x1xf32>,
    %c0_15 = arith.constant 0 : index
    %c0_16 = arith.constant 0 : index
    %35 = vector.load %arg7[%c0_15, %c0_16] : memref<8x1xf32, #tpu.memory_space<vmem>>, vector<8x1xf32>
    %cst_17 = arith.constant 0.000000e+00 : f32
    %36 = vector.broadcast %cst_17 : f32 to vector<8x128xf32>
    %37 = arith.select %11, %4, %36 : vector<8x128xi1>, vector<8x128xf32>
    %cst_18 = arith.constant dense<0.000000e+00> : vector<8xf32>
    %38 = vector.multi_reduction <add>, %37, %cst_18 [1] : vector<8x128xf32> to vector<8xf32>
    %39 = vector.shape_cast %38 : vector<8xf32> to vector<8x1xf32>
    %40 = arith.addf %35, %39 : vector<8x1xf32>
    %c0_19 = arith.constant 0 : index
    %c0_20 = arith.constant 0 : index
    %41 = vector.load %arg7[%c0_19, %c0_20] : memref<8x1xf32, #tpu.memory_space<vmem>>, vector<8x1xf32>
    tpu.vector_store %arg7[%c0_19, %c0_20], %40 {strides = array<i32>} : memref<8x1xf32, #tpu.memory_space<vmem>>, vector<8x1xf32>,
    %c2_i32 = arith.constant 2 : i32
    %42 = arith.cmpi eq, %arg1, %c2_i32 : i32
    %43 = arith.extui %42 : i1 to i32
    %c0_i32_21 = arith.constant 0 : i32
    %44 = arith.cmpi ne, %43, %c0_i32_21 : i32
    scf.if %44 {
      %c0_22 = arith.constant 0 : index
      %c0_23 = arith.constant 0 : index
      %45 = vector.load %arg7[%c0_22, %c0_23] : memref<8x1xf32, #tpu.memory_space<vmem>>, vector<8x1xf32>
      %46 = arith.mulf %45, %45 : vector<8x1xf32>
      %cst_24 = arith.constant 1.000000e+00 : f32
      %47 = vector.broadcast %cst_24 : f32 to vector<8x1xf32>
      %48 = arith.subf %47, %46 : vector<8x1xf32>
      %cst_25 = arith.constant 0.000000e+00 : f32
      %49 = vector.broadcast %cst_25 : f32 to vector<8x1xf32>
      %50 = arith.maximumf %48, %49 : vector<8x1xf32>
      %51 = math.sqrt %50 : vector<8x1xf32>
      %cst_26 = arith.constant 0.980066597 : f32
      %52 = vector.broadcast %cst_26 : f32 to vector<8x1xf32>
      %53 = arith.mulf %45, %52 : vector<8x1xf32>
      %cst_27 = arith.constant 0.198669329 : f32
      %54 = vector.broadcast %cst_27 : f32 to vector<8x1xf32>
      %55 = arith.mulf %51, %54 : vector<8x1xf32>
      %56 = arith.subf %53, %55 : vector<8x1xf32>
      %cst_28 = arith.constant -0.980066597 : f32
      %57 = vector.broadcast %cst_28 : f32 to vector<8x1xf32>
      %58 = arith.cmpf ogt, %45, %57 : vector<8x1xf32>
      %cst_29 = arith.constant 0.019933423 : f32
      %59 = vector.broadcast %cst_29 : f32 to vector<8x1xf32>
      %60 = arith.subf %45, %59 : vector<8x1xf32>
      %61 = arith.select %58, %56, %60 : vector<8x1xi1>, vector<8x1xf32>
      %cst_30 = arith.constant 3.200000e+01 : f32
      %62 = vector.broadcast %cst_30 : f32 to vector<8x1xf32>
      %63 = arith.mulf %61, %62 : vector<8x1xf32>
      %c0_31 = arith.constant 0 : index
      %c0_32 = arith.constant 0 : index
      %64 = vector.load %arg5[%c0_31, %c0_32] : memref<8x1xf32, #tpu.memory_space<vmem>>, vector<8x1xf32>
      %65 = arith.maximumf %64, %63 : vector<8x1xf32>
      %c0_33 = arith.constant 0 : index
      %c0_34 = arith.constant 0 : index
      %66 = vector.load %arg6[%c0_33, %c0_34] : memref<8x1xf32, #tpu.memory_space<vmem>>, vector<8x1xf32>
      %67 = arith.subf %64, %65 : vector<8x1xf32>
      %68 = math.exp %67 : vector<8x1xf32>
      %69 = arith.mulf %66, %68 : vector<8x1xf32>
      %70 = arith.subf %63, %65 : vector<8x1xf32>
      %71 = math.exp %70 : vector<8x1xf32>
      %72 = arith.addf %69, %71 : vector<8x1xf32>
      %73 = math.log %72 : vector<8x1xf32>
      %74 = arith.addf %65, %73 : vector<8x1xf32>
      %75 = arith.subf %74, %63 : vector<8x1xf32>
      %76 = tpu.iota {dimensions = array<i32: 0>} : vector<8x1xi32>
      %c8_i32 = arith.constant 8 : i32
      %77 = arith.muli %arg0, %c8_i32 : i32
      %78 = vector.broadcast %77 : i32 to vector<8x1xi32>
      %79 = arith.addi %76, %78 : vector<8x1xi32>
      %c10_i32 = arith.constant 10 : i32
      %80 = vector.broadcast %c10_i32 : i32 to vector<8x1xi32>
      %81 = arith.cmpi slt, %79, %80 : vector<8x1xi32>
      %cst_35 = arith.constant 0.000000e+00 : f32
      %82 = vector.broadcast %cst_35 : f32 to vector<8x1xf32>
      %83 = arith.select %81, %75, %82 : vector<8x1xi1>, vector<8x1xf32>
      %c0_36 = arith.constant 0 : index
      %c0_37 = arith.constant 0 : index
      %84 = vector.load %arg4[%c0_36, %c0_37] : memref<8x1xf32, #tpu.memory_space<vmem>>, vector<8x1xf32>
      tpu.vector_store %arg4[%c0_36, %c0_37], %83 {strides = array<i32>} : memref<8x1xf32, #tpu.memory_space<vmem>>, vector<8x1xf32>,
    } else {
    }
    return
  }
  func.func @transform_0(%arg0: i32, %arg1: i32) -> (i32, i32) {
    %c0_i32 = arith.constant 0 : i32
    return %arg0, %arg1 : i32, i32
  }
  func.func @transform_1(%arg0: i32, %arg1: i32) -> (i32, i32) {
    %c0_i32 = arith.constant 0 : i32
    %c0_i32_0 = arith.constant 0 : i32
    return %arg0, %c0_i32 : i32, i32
  }
  func.func @transform_2(%arg0: i32, %arg1: i32) -> (i32, i32) {
    %c0_i32 = arith.constant 0 : i32
    %c0_i32_0 = arith.constant 0 : i32
    return %arg0, %c0_i32 : i32, i32
  }
}

</mosaic_0001>

<bundles_post_ra>
// kernel: tpu_custom_call.1
= control target key start
LH: loop header
LB: loop body
LE: loop exit
PB: predicated region body
PF: predicated region fallthrough
CT: control target
= control target key end

     0   :  { %7 = vsyncpa [#allocation6], 0  ;;  %s769_s0 = inlined_call_operand.hbm [shape: bf16[16,384], index: 0, kind: input, shape index: {}]   ;;  %s770_s1 = inlined_call_operand.vmem [shape: s32[16,1], index: 1, kind: input, shape index: {}]   ;;  %s771_s2 = inlined_call_operand.vmem [shape: f32[16,1], index: 2, kind: output, shape index: {}]  }
   0x1   :  { %9 = vsyncpa [#allocation6 + $0x1], 0  ;;  %s603_s9 = smov 0   ;;  %s605_s10 = smov 0  }
   0x2   :  { %s607_s11 = smov 0   ;;  %s609_s12 = smov 0  }
   0x3   :  { %s611_s13 = smov 0   ;;  %s613_s14 = smov 0  }
   0x4   :  { %s615_s15 = smov 0   ;;  %s617_s16 = smov 0  }
   0x5 LB: > { %s380_s17 = sadd.s32 4294967295, %s582_s16   ;;  %s24_s18 = sadd.s32 1, %s574_s14  ;;  %s582_s16 = sphi %s617_s16, %s15_s16   ;;  %s578_s15 = sphi %s615_s15, %s783_s15   ;;  %s574_s14 = sphi %s613_s14, %s782_s14   ;;  %s570_s13 = sphi %s611_s13, %s781_s13   ;;  %s566_s12 = sphi %s609_s12, %s780_s12   ;;  %s562_s11 = sphi %s607_s11, %s779_s11   ;;  %s558_s10 = sphi %s605_s10, %s778_s10   ;;  %s554_s9 = sphi %s603_s9, %s777_s9  }
   0x6   : > { %p25_p0 = scmp.ge.s32.totalorder %s24_s18, 3  ;;  %s27_s19 = sadd.s32 1, %s578_s15 }
   0x7   : > { %s36_s20 = sadd.s32 1, %s562_s11  ;;  %p43_p1 = scmp.ne.s32.totalorder %s562_s11, %s558_s10 }
   0x8   : > { %s785_s18 = smov (%p25_p0, %s24_s18), 0  ;;  %s787_s19 = smov (!%p25_p0, %s27_s19), %s578_s15 }
   0x9   : > { %s32_s21 = ssub.s32 %s574_s14, %s785_s18  ;;  %p44_p2 = scmp.eq.s32.totalorder %s582_s16, 0 }
   0xa   : > { %p29_p3 = scmp.ge.s32.totalorder %s787_s19, 2  ;;  %p49_p4 = scmp.ne.s32.totalorder %s558_s10, %s554_s9 }
   0xb   : > { %p654_p5 = por %p44_p2, %p43_p1  ;;  %p50_p6 = scmp.eq.s32.totalorder %s380_s17, 0 }
   0xc   : > { %s789_s19 = smov (%p29_p3, %s787_s19), 0  ;;  %p404_p8 = scmp.lt.s32.totalorder %s582_s16, 6 }
   0xd   : > { %p660_p7 = por %p50_p6, %p49_p4  ;;  %s31_s24 = ssub.s32 %s578_s15, %s789_s19 }
   0xe   : > { %s33_s25 = sor.u32 %s32_s21, %s31_s24  ;;  %s125_s26 = sand.u32 1, %s562_s11  }
   0xf   : > { %p34_p9 = scmp.eq.s32.totalorder %s33_s25, 0  ;;  %s384_s27 = sshll.u32 %s125_s26, 2 }
  0x10   : > { %s397_s28 = smul.u32 3, %s578_s15  ;;  %s129_s4 = scalar_lea.vmem [#allocation5], %s384_s27 }
  0x11   : > { %s670_s29 = scalar_select %p34_p9, %s562_s11, %s36_s20  }
  0x12   : > { %s134_s30 = sadd.s32 %s574_s14, %s397_s28  ;;  %s138_s5 = sshll.u32 %s129_s4, 4  ;;  %s678_s5 = int_to_ptr.vmem [resolvable:$true] %s138_s5 }
  0x13   : > { %s385_s3 = sshll.u32 %s134_s30, 6  ;;  %p684_p10 = pnand %p404_p8, %p654_p5 }
  0x14   : > { %s676_s8 = scalar_lea.hbm %s769_s0, %s385_s3  ;;  %s126_s17 = scalar_lea.sflag [#allocation6], %s125_s26 }
  0x15   : > { %s486_s20 = scalar_lea.hbm %s676_s8, 64  ;;  %p488_p0 = pneg %p684_p10 }
  0x16   : > { %p487_p13 = scmp.ne.s32.totalorder %s676_s8, %s486_s20  ;;  %s491_s24 = scalar_lea.hbm %s769_s0, 384 }
  0x17   : > { %p492_p3 = scmp.lt.u32.totalorder %s676_s8, %s769_s0  ;;  %p493_p4 = scmp.lt.u32.totalorder %s491_s24, %s486_s20 }
  0x18   : > { %p489_p1 = pnand %p488_p0, %p487_p13  ;;  %p495_p6 = scmp.lt.u32.totalorder %s486_s20, %s676_s8 }
  0x19   : > { %p494_p5 = por %p493_p4, %p492_p3 }
  0x1a   : > { %p490_p2 = pneg %p489_p1 }
  0x1b   : > { %p496_p8 = por %p495_p6, %p494_p5 }
  0x1d   : > { %p497_p9 = pnand %p496_p8, %p490_p2 }
  0x1f   : > { %500 = shalt.err (!%p497_p9)
}
  0x20   : > { %s501_s26 = scalar_lea.vmem %s678_s5, 64  ;;  %s584_s28 = smov [#allocation5]  }
  0x21   : > { %p502_p13 = scmp.ne.s32.totalorder %s678_s5, %s501_s26  ;;  %s506_s30 = sshll.u32 %s584_s28, 4  ;;  %s507_s30 = int_to_ptr.vmem [resolvable:$false] %s506_s30 }
  0x22   : > { %s508_s3 = scalar_lea.vmem %s507_s30, 128  ;;  %p509_p12 = scmp.lt.s32.totalorder %s678_s5, %s507_s30 }
  0x23   : > { %p504_p1 = pnand %p502_p13, %p488_p0  ;;  %p510_p3 = scmp.lt.s32.totalorder %s508_s3, %s501_s26 }
  0x25   : > { %p505_p11 = pneg %p504_p1  ;;  %p511_p4 = por %p510_p3, %p509_p12 }
  0x27   : > { %p512_p5 = pnand %p511_p4, %p505_p11 }
  0x29   : > { %515 = shalt.err (!%p512_p5)
}
  0x2a   : > { %403 = dma.hbm_to_vmem [thread:$0]  (!%p684_p10), %s676_s8, 64, %s678_s5, %s126_s17  }
  0x2b   : > { %p775_p2 = scmp.lt.s32.totalorder %s582_s16, 7  ;;  %p776_p6 = scmp.ge.s32.totalorder %s582_s16, 1 }
  0x2d   : > { %p151_p0 = pnand %p776_p6, %p775_p2 }
  0x2e   : > { %s156_s4 = sand.u32 (!%p151_p0), 1, %s558_s10  }
  0x2f   : > { %154 = sbr.rel (%p151_p0) target bundleno = 660 (0x294), region = 28  ;;  %s387_s6 = sshll.u32 (!%p151_p0), %s156_s4, 2 }
  0x30   : > { %s157_s7 = scalar_lea.sflag (!%p151_p0), [#allocation6], %s156_s4  ;;  %s160_s20 = scalar_lea.vmem (!%p151_p0), [#allocation5], %s387_s6 }
  0x36   : > { %549 = dma.done.wait (%p660_p7), %s157_s7, 64  }
  0x37   : > { %551 = vsyncadd (%p660_p7), %s157_s7, 4294967232  ;;  %p184_p11 = scmp.lt.s32.totalorder %s570_s13, 1  ;;  %p390_p10 = scmp.ne.s32.totalorder %s566_s12, 0 }
  0x38   : > { %vm196_vm0 = vcmask (!%p390_p10), 7168   ;;  %v585_v0 = vmov (!%p390_p10), -1e+30   ;;  %v586_v1 = vmov (!%p390_p10), 0.0  }
  0x39   : > { %s185_s9 = scalar_select %p184_p11, %s570_s13, 1 }
  0x3a   : > { %195 = sbr.rel (%p390_p10) target bundleno = 65 (0x41), region = 36  ;;  %197 = vst.msk [vmem:[#allocation2] sm:$0xff] (!%p390_p10), %vm196_vm0, %v585_v0  ;;  %198 = vst.msk [vmem:[#allocation3] sm:$0xff] (!%p390_p10), %vm196_vm0, %v586_v1 }
  0x3b   : > { %s388_s5 = sshll.u32 %s185_s9, 3  ;;  %199 = vst.msk [vmem:[#allocation4] sm:$0xff] (!%p390_p10), %vm196_vm0, %v586_v1 }
  0x3c   : > { %s187_s21 = scalar_lea.vmem %s770_s1, %s388_s5  ;;  %s732_s25 = scalar_lea.vmem %s771_s2, %s388_s5 }
  0x41 PF: > { %v202_v2 = vld [vmem:[%s187_s21] sm:$0xff]  ;;  %v587_v3 = vmov 0   ;;  %v203_v4 = vlaneseq  ;;  %s391_s23 = sshll.u32 %s566_s12, 7  ;;  %v200_v7 = vld [vmem:[%s160_s20] sm:$0xf]  ;;  %vm236_vm4 = vcmask 7168  }
  0x42   : > { %472 = vset.pattern.permute.xlu0 %v587_v3  ;;  %473 = vset.pattern.permute.xlu1 %v587_v3  ;;  %v206_v6 = vstv %s391_s23  ;;  %v201_v9 = vunpack.c.l.bf16 %v200_v7  ;;  %v216_v14 = vld [vmem:[#allocation2] sm:$0xff]  ;;  %v239_v17 = vld [vmem:[#allocation4] sm:$0xff]  ;;  %v220_v27 = vld [vmem:[#allocation3] sm:$0xff]  ;;  %p392_p7 = scmp.ne.s32.totalorder %s566_s12, 2 }
  0x43   : > { %209 = vperm.xlu0 %472, %v202_v2   ;;  %v204_v5 = vand.u32 127, %v203_v4  ;;  %s394_s12 = sshll.u32 (!%p392_p7), %s570_s13, 3  ;;  %v283_v57 = vshrl.u32 (!%p392_p7), %v203_v4, 7 }
  0x44   : > { %v214_v10 = vmul.f32 32.0, %v201_v9  ;;  %v285_v58 = vstv (!%p392_p7), %s394_s12 }
  0x45   : > { %v207_v8 = vadd.s32 %v206_v6, %v204_v5  ;;  %v286_v60 = vadd.s32 (!%p392_p7), %v285_v58, %v283_v57 }
  0x47   : > { %vm212_vm1 = vcmp.ge.s32.totalorder %v207_v8, 300  ;;  %vm287_vm8 = vcmp.lt.s32.totalorder (!%p392_p7), %v286_v60, 10 }
  0xc2   : > { %v210_v11 = vpop.permute.xlu0 %209 }
  0xc3   : > { %vm211_vm2 = vcmp.eq.s32.totalorder %v207_v8, %v210_v11 }
  0xc4   : > { %vm213_vm3 = vmor %vm211_vm2, %vm212_vm1  ;;  %v240_v13 = vsel %vm211_vm2, %v201_v9, 0.0 }
  0xc5   : > { %v215_v12 = vsel %vm213_vm3, -1e+30, %v214_v10 }
  0xc6   : > { %217 = vmax.xlane.f32.xlu0 %v215_v12 }
  0xca   : > { %241 = vadd.xlane.f32.xlu0 %v240_v13 }
 0x153   : > { %v218_v15 = vpop.xlane.xlu0 %217 }
 0x154   : > { %v219_v16 = vmax.f32 %v216_v14, %v218_v15 }
 0x156   : > { %v221_v18 = vsub.f32 %v216_v14, %v219_v16  ;;  %238 = vst.msk [vmem:[#allocation2] sm:$0xff] %vm236_vm4, %v219_v16  ;;  %227 = vperm.xlu1 %473, %v219_v16  }
 0x157   : > { %v242_v19 = vpop.xlane.xlu0 %241 }
 0x158   : > { %v243_v20 = vadd.f32 %v242_v19, %v239_v17  ;;  %v222_v25 = vmul.f32 1.442695, %v221_v18 }
 0x15a   : > { %244 = vst.msk [vmem:[#allocation4] sm:$0xff] %vm236_vm4, %v243_v20 }
 0x15d   : > { %v267_v45 = vld [vmem:[#allocation2] sm:$0xff] (!%p392_p7) }
 0x161   : > { %v249_v31 = vld [vmem:[#allocation4] sm:$0xff] (!%p392_p7) }
 0x162   : > { %v250_v32 = vmul.f32 (!%p392_p7), %v249_v31, %v249_v31  ;;  %v260_v39 = vmul.f32 (!%p392_p7), 0.9800666, %v249_v31  ;;  %v393_v42 = vadd.f32 (!%p392_p7), -0.019933423, %v249_v31  ;;  %vm263_vm7 = vcmp.gt.f32.partialorder (!%p392_p7), %v249_v31, -0.9800666 }
 0x164   : > { %v251_v33 = vsub.f32 (!%p392_p7), 1.0, %v250_v32 }
 0x166   : > { %v252_v34 = vmax.f32 (!%p392_p7), %v251_v33, 0.0 }
 0x168   : > { %vm255_vm5 = vcmp.eq.f32.partialorder (!%p392_p7), %v252_v34, inf  ;;  %v258_v36 = vand.u32 (!%p392_p7), 2147483648, %v252_v34  ;;  %vm257_vm6 = vcmp.eq.f32.partialorder (!%p392_p7), %v252_v34, 0.0 }
 0x1d5   : > { %v228_v21 = vpop.permute.xlu1 %227 }
 0x1d6   : > { %v230_v22 = vsub.f32 %v215_v12, %v228_v21 }
 0x1d8   : > { %v231_v23 = vmul.f32 1.442695, %v230_v22 }
 0x1da   : > { %474 = vpow2.f32 %v231_v23 }
 0x1db   : > { %476 = vpow2.f32 %v222_v25 }
 0x1dc   : > { %478 = vrsqrt.f32 (!%p392_p7), %v252_v34 }
 0x1e4   : > { %v475_v24 = vpop.eup %474 }
 0x1e5   : > { %233 = vadd.xlane.f32.xlu1 %v475_v24  ;;  %v477_v26 = vpop.eup %476 }
 0x1e6   : > { %v224_v28 = vmul.f32 %v477_v26, %v220_v27  ;;  %v479_v35 = vpop.eup (!%p392_p7), %478 }
 0x1e7   : > { %v254_v37 = vmul.f32 (!%p392_p7), %v479_v35, %v252_v34 }
 0x1e9   : > { %v256_v38 = vsel (!%p392_p7), %vm255_vm5, %v252_v34, %v254_v37 }
 0x1ea   : > { %v259_v40 = vsel (!%p392_p7), %vm257_vm6, %v258_v36, %v256_v38 }
 0x1eb   : > { %v261_v41 = vmul.f32 (!%p392_p7), 0.19866933, %v259_v40 }
 0x1ed   : > { %v262_v43 = vsub.f32 (!%p392_p7), %v260_v39, %v261_v41 }
 0x1ef   : > { %v265_v44 = vsel (!%p392_p7), %vm263_vm7, %v262_v43, %v393_v42 }
 0x1f0   : > { %v266_v46 = vmul.f32 (!%p392_p7), 32.0, %v265_v44 }
 0x1f2   : > { %v268_v47 = vmax.f32 (!%p392_p7), %v267_v45, %v266_v46 }
 0x1f4   : > { %v270_v48 = vsub.f32 (!%p392_p7), %v267_v45, %v268_v47  ;;  %v274_v49 = vsub.f32 (!%p392_p7), %v266_v46, %v268_v47 }
 0x1f6   : > { %v271_v50 = vmul.f32 (!%p392_p7), 1.442695, %v270_v48  ;;  %v275_v51 = vmul.f32 (!%p392_p7), 1.442695, %v274_v49 }
 0x1f8   : > { %480 = vpow2.f32 (!%p392_p7), %v271_v50 }
 0x1f9   : > { %482 = vpow2.f32 (!%p392_p7), %v275_v51 }
 0x202   : > { %v481_v53 = vpop.eup (!%p392_p7), %480 }
 0x203   : > { %v483_v54 = vpop.eup (!%p392_p7), %482 }
 0x26f   : > { %248 = sbr.rel (%p392_p7) target bundleno = 660 (0x294), region = 40 }
 0x272   : > { %v234_v29 = vpop.xlane.xlu1 %233 }
 0x273   : > { %v235_v30 = vadd.f32 %v234_v29, %v224_v28 }
 0x275   : > { %237 = vst.msk [vmem:[#allocation3] sm:$0xff] %vm236_vm4, %v235_v30 }
 0x27c   : > { %v269_v52 = vld [vmem:[#allocation3] sm:$0xff] }
 0x27d   : > { %v273_v55 = vmul.f32 %v481_v53, %v269_v52 }
 0x27f   : > { %v277_v56 = vadd.f32 %v483_v54, %v273_v55 }
 0x281   : > { %484 = vlog2.f32 %v277_v56 }
 0x28b   : > { %v485_v59 = vpop.eup %484 }
 0x28c   : > { %v279_v61 = vmul.f32 0.6931472, %v485_v59 }
 0x28e   : > { %v280_v62 = vadd.f32 %v279_v61, %v268_v47 }
 0x290   : > { %v281_v63 = vsub.f32 %v280_v62, %v266_v46 }
 0x292   : > { %v288_v0 = vsel %vm287_vm8, %v281_v63, 0.0 }
 0x293   : > { %289 = vst.msk [vmem:[%s732_s25] sm:$0xff] %vm236_vm4, %v288_v0 }
 0x294 PF: > { %s15_s16 = sadd.s32 1, %s582_s16   ;;  %s777_s9 = smov %s558_s10 }
 0x295   : > { %p12_p12 = scmp.ge.s32.totalorder %s15_s16, 8   ;;  %s778_s10 = smov %s562_s11 }
 0x296   : > { %s779_s11 = smov %s670_s29  ;;  %s780_s12 = smov %s574_s14 }
 0x297   : > { %s781_s13 = smov %s578_s15  ;;  %s782_s14 = smov %s785_s18 }
 0x298   : > { %s783_s15 = smov %s789_s19  ;;  %14 = sbr.rel (!%p12_p12) target bundleno = 5 (0x5), region = 79 }
 0x29f   :  { %309 = vsyncpa [#allocation6], 1 }
 0x2a0   :  { %311 = vsyncpa [#allocation6 + $0x1], 1 }

</bundles_post_ra>
